<compile_context>
chip_gen: v7x
topology: tpu7x:2x2x1
jax: 0.10.0
libtpu: 0.0.40
codegen_flags: <defaults>
</compile_context>

<pallas_src>
import functools

import jax
import jax.numpy as jnp
from jax.experimental import pallas as pl
from jax.experimental.pallas import tpu as pltpu

LANE = 128     # vreg lane width (last dim)
SUBLANE = 8    # vreg sublane count (second-to-last dim)


def _round_up(n, m):
    return ((n + m - 1) // m) * m


# -----------------------------------------------------------------------------
# Fused MLP kernel
# -----------------------------------------------------------------------------
def _fused_mlp_kernel(*refs, num_layers):
    """refs = (x_ref, w0, b0, w1, b1, ..., w_{L-1}, b_{L-1}, o_ref).

    h = x
    layer 0  (start_layer):      h = h @ w0 + b0                (no activation)
    layers 1..L-2 (linear_idx):  h = relu(h @ w + b)            (dropout = identity)
    layer L-1 (final):           h = relu(h @ w + b)
    Activations never leave the core.
    """
    x_ref = refs[0]
    o_ref = refs[-1]
    h = x_ref[...].astype(jnp.float32)
    for li in range(num_layers):
        w_ref = refs[1 + 2 * li]
        b_ref = refs[2 + 2 * li]
        h = jnp.dot(h, w_ref[...], preferred_element_type=jnp.float32)
        h = h + b_ref[...]            # (1, N) bias broadcasts over sublanes
        if li > 0:                    # ReLU after every layer except start_layer
            h = jnp.maximum(h, 0.0)
    o_ref[...] = h.astype(o_ref.dtype)


def fused_mlp(x_pad, padded_params):
    """x_pad: [M_pad, K0_pad] f32 (sublane/lane padded).
    padded_params: list of (w [K_pad, N_pad], b [1, N_pad]) with K_pad, N_pad
    multiples of 128. Returns padded logits [M_pad, N_last_pad]."""
    M, K0 = x_pad.shape
    num_layers = len(padded_params)
    n_out = padded_params[-1][0].shape[1]

    # Tile over the batch axis only; the weights are tiny and fully VMEM-resident
    # (constant index_map -> fetched once, revisited across grid steps).
    tm = 128 if (M % 128 == 0 and M > 128) else M
    assert M % tm == 0 and tm % SUBLANE == 0

    in_specs = [pl.BlockSpec((tm, K0), lambda i: (i, 0))]
    flat_args = [x_pad]
    for w, b in padded_params:
        kw, nw = w.shape
        in_specs.append(pl.BlockSpec((kw, nw), lambda i: (0, 0)))
        in_specs.append(pl.BlockSpec((1, nw), lambda i: (0, 0)))
        flat_args.append(w)
        flat_args.append(b)

    return pl.pallas_call(
        functools.partial(_fused_mlp_kernel, num_layers=num_layers),
        out_shape=jax.ShapeDtypeStruct((M, n_out), x_pad.dtype),
        grid=(M // tm,),
        in_specs=in_specs,
        out_specs=pl.BlockSpec((tm, n_out), lambda i: (i, 0)),
        compiler_params=pltpu.CompilerParams(
            # Batch tiles are independent -> "parallel" (megacore sharding on v7x).
            dimension_semantics=("parallel",),
            # Modest explicit budget: safe on v5e/v6e (128 MiB) and v7x (64 MiB),
            # and far above what this tiny network needs.
            vmem_limit_bytes=32 * 1024 * 1024,
        ),
    )(*flat_args)


# -----------------------------------------------------------------------------
# Parameters (PyTorch-style nn.Linear init), stored as [in, out] and zero-padded
# once up-front to lane-dense (multiple-of-128) shapes.
# -----------------------------------------------------------------------------
def init_linear_params(key, in_features, out_features):
    kw, kb = jax.random.split(key)
    bound = 1.0 / jnp.sqrt(jnp.float32(in_features))
    w = jax.random.uniform(kw, (in_features, out_features), jnp.float32,
                           minval=-bound, maxval=bound)
    b = jax.random.uniform(kb, (1, out_features), jnp.float32,
                           minval=-bound, maxval=bound)
    return w, b


def pad_linear_params(w, b):
    k, n = w.shape
    kp, np_ = _round_up(k, LANE), _round_up(n, LANE)
    w_pad = jnp.zeros((kp, np_), w.dtype).at[:k, :n].set(w)
    b_pad = jnp.zeros((1, np_), b.dtype).at[:, :n].set(b)
    # Zero padding keeps the padded lanes exactly 0 through the whole chain, so
    # the sliced output is bit-for-bit the unpadded computation.
    return w_pad, b_pad


# -----------------------------------------------------------------------------
# Forward (replicates Simple_Net.forward, eval mode)
# -----------------------------------------------------------------------------
def simple_net_forward(x, padded_params, *, num_classes):
    B = x.shape[0]
    x = x.reshape(B, -1)                       # nn.Flatten(): row-major over C,H,W
    k_in = x.shape[1]

    if B > 128:
        m_pad = _round_up(B, 128)
    else:
        m_pad = _round_up(max(B, SUBLANE), SUBLANE)
    k_pad = padded_params[0][0].shape[0]

    x_pad = jnp.zeros((m_pad, k_pad), x.dtype).at[:B, :k_in].set(x)
    y_pad = fused_mlp(x_pad, padded_params)
    return y_pad[:B, :num_classes]


def reference_forward(x, params_list):
    """Pure-JAX reference (same math, no Pallas)."""
    B = x.shape[0]
    h = x.reshape(B, -1)
    for li, (w, b) in enumerate(params_list):
        h = jnp.dot(h, w, precision=jax.lax.Precision.HIGHEST) + b
        if li > 0:
            h = jnp.maximum(h, 0.0)
    return h


if __name__ == "__main__":
    # Small shapes consistent with the module: x [B, C, H, W] -> input_size = 64.
    # B = 8 exactly fills the 8 sublanes of a vreg.
    B, C, H, W = 8, 4, 4, 4
    input_size = C * H * W          # 64
    layer_sizes = [32, 32, 16]
    num_classes = 8

    key = jax.random.PRNGKey(0)
    k_x, k_start, k_final, *k_hidden = jax.random.split(
        key, 3 + (len(layer_sizes) - 1))

    x = jax.random.normal(k_x, (B, C, H, W), dtype=jnp.float32)

    # Ordered layer list: start_layer, linear_1..linear_{L-1}, final.
    params_list = [init_linear_params(k_start, input_size, layer_sizes[0])]
    for idx in range(1, len(layer_sizes)):
        params_list.append(
            init_linear_params(k_hidden[idx - 1], layer_sizes[idx - 1], layer_sizes[idx]))
    params_list.append(init_linear_params(k_final, layer_sizes[-1], num_classes))

    # Pad once, outside the forward pass (lane-dense, VMEM-friendly layout).
    padded_params = [pad_linear_params(w, b) for (w, b) in params_list]

    fwd = jax.jit(functools.partial(simple_net_forward, num_classes=num_classes))
    out = jax.block_until_ready(fwd(x, padded_params))

    assert out.shape == (B, num_classes), out.shape
    assert bool(jnp.all(out >= 0.0))  # final ReLU guarantees non-negative

    ref = reference_forward(x, params_list)
    max_err = float(jnp.max(jnp.abs(out - ref)))
    assert jnp.allclose(out, ref, atol=2e-2, rtol=2e-2), max_err

    print("KERNEL_OK")
</pallas_src>

<mosaic_0001>
module attributes {stable_mosaic.version = 11 : i64} {
  func.func @_fused_mlp_kernel(%arg0: i32, %arg1: memref<8x128xf32, #tpu.memory_space<vmem>>, %arg2: memref<128x128xf32, #tpu.memory_space<vmem>>, %arg3: memref<1x128xf32, #tpu.memory_space<vmem>>, %arg4: memref<128x128xf32, #tpu.memory_space<vmem>>, %arg5: memref<1x128xf32, #tpu.memory_space<vmem>>, %arg6: memref<128x128xf32, #tpu.memory_space<vmem>>, %arg7: memref<1x128xf32, #tpu.memory_space<vmem>>, %arg8: memref<128x128xf32, #tpu.memory_space<vmem>>, %arg9: memref<1x128xf32, #tpu.memory_space<vmem>>, %arg10: memref<8x128xf32, #tpu.memory_space<vmem>>) attributes {dimension_semantics = [#tpu.dimension_semantics<parallel>], iteration_bounds = array<i64: 1>, scalar_prefetch = 0 : i64, scratch_operands = 0 : i64, tpu.core_type = #tpu.core_type<tc>, window_params = [{transform_indices = @transform_0, window_bounds = array<i64: 8, 128>}, {pipeline_mode = #tpu.pipeline_mode<synchronous>, transform_indices = @transform_1, window_bounds = array<i64: 128, 128>}, {pipeline_mode = #tpu.pipeline_mode<synchronous>, transform_indices = @transform_2, window_bounds = array<i64: 1, 128>}, {pipeline_mode = #tpu.pipeline_mode<synchronous>, transform_indices = @transform_3, window_bounds = array<i64: 128, 128>}, {pipeline_mode = #tpu.pipeline_mode<synchronous>, transform_indices = @transform_4, window_bounds = array<i64: 1, 128>}, {pipeline_mode = #tpu.pipeline_mode<synchronous>, transform_indices = @transform_5, window_bounds = array<i64: 128, 128>}, {pipeline_mode = #tpu.pipeline_mode<synchronous>, transform_indices = @transform_6, window_bounds = array<i64: 1, 128>}, {pipeline_mode = #tpu.pipeline_mode<synchronous>, transform_indices = @transform_7, window_bounds = array<i64: 128, 128>}, {pipeline_mode = #tpu.pipeline_mode<synchronous>, transform_indices = @transform_8, window_bounds = array<i64: 1, 128>}, {transform_indices = @transform_9, window_bounds = array<i64: 8, 128>}]} {
    %c0 = arith.constant 0 : index
    %c0_0 = arith.constant 0 : index
    %0 = vector.load %arg1[%c0, %c0_0] : memref<8x128xf32, #tpu.memory_space<vmem>>, vector<8x128xf32>
    %c0_1 = arith.constant 0 : index
    %c0_2 = arith.constant 0 : index
    %1 = vector.load %arg2[%c0_1, %c0_2] : memref<128x128xf32, #tpu.memory_space<vmem>>, vector<128x128xf32>
    %cst = arith.constant dense<0.000000e+00> : vector<8x128xf32>
    %2 = tpu.matmul %0, %1, %cst {dimension_numbers = #tpu.dot_dimension_numbers<[1], [0], [0], [1], [0, 0, 1, 1], [], []>} : vector<8x128xf32>, vector<128x128xf32>, vector<8x128xf32> -> vector<8x128xf32>
    %c0_3 = arith.constant 0 : index
    %c0_4 = arith.constant 0 : index
    %3 = vector.load %arg3[%c0_3, %c0_4] : memref<1x128xf32, #tpu.memory_space<vmem>>, vector<1x128xf32>
    %4 = vector.broadcast %3 : vector<1x128xf32> to vector<8x128xf32>
    %5 = arith.addf %2, %4 : vector<8x128xf32>
    %c0_5 = arith.constant 0 : index
    %c0_6 = arith.constant 0 : index
    %6 = vector.load %arg4[%c0_5, %c0_6] : memref<128x128xf32, #tpu.memory_space<vmem>>, vector<128x128xf32>
    %cst_7 = arith.constant dense<0.000000e+00> : vector<8x128xf32>
    %7 = tpu.matmul %5, %6, %cst_7 {dimension_numbers = #tpu.dot_dimension_numbers<[1], [0], [0], [1], [0, 0, 1, 1], [], []>} : vector<8x128xf32>, vector<128x128xf32>, vector<8x128xf32> -> vector<8x128xf32>
    %c0_8 = arith.constant 0 : index
    %c0_9 = arith.constant 0 : index
    %8 = vector.load %arg5[%c0_8, %c0_9] : memref<1x128xf32, #tpu.memory_space<vmem>>, vector<1x128xf32>
    %9 = vector.broadcast %8 : vector<1x128xf32> to vector<8x128xf32>
    %10 = arith.addf %7, %9 : vector<8x128xf32>
    %cst_10 = arith.constant 0.000000e+00 : f32
    %11 = vector.broadcast %cst_10 : f32 to vector<8x128xf32>
    %12 = arith.maximumf %10, %11 : vector<8x128xf32>
    %c0_11 = arith.constant 0 : index
    %c0_12 = arith.constant 0 : index
    %13 = vector.load %arg6[%c0_11, %c0_12] : memref<128x128xf32, #tpu.memory_space<vmem>>, vector<128x128xf32>
    %cst_13 = arith.constant dense<0.000000e+00> : vector<8x128xf32>
    %14 = tpu.matmul %12, %13, %cst_13 {dimension_numbers = #tpu.dot_dimension_numbers<[1], [0], [0], [1], [0, 0, 1, 1], [], []>} : vector<8x128xf32>, vector<128x128xf32>, vector<8x128xf32> -> vector<8x128xf32>
    %c0_14 = arith.constant 0 : index
    %c0_15 = arith.constant 0 : index
    %15 = vector.load %arg7[%c0_14, %c0_15] : memref<1x128xf32, #tpu.memory_space<vmem>>, vector<1x128xf32>
    %16 = vector.broadcast %15 : vector<1x128xf32> to vector<8x128xf32>
    %17 = arith.addf %14, %16 : vector<8x128xf32>
    %cst_16 = arith.constant 0.000000e+00 : f32
    %18 = vector.broadcast %cst_16 : f32 to vector<8x128xf32>
    %19 = arith.maximumf %17, %18 : vector<8x128xf32>
    %c0_17 = arith.constant 0 : index
    %c0_18 = arith.constant 0 : index
    %20 = vector.load %arg8[%c0_17, %c0_18] : memref<128x128xf32, #tpu.memory_space<vmem>>, vector<128x128xf32>
    %cst_19 = arith.constant dense<0.000000e+00> : vector<8x128xf32>
    %21 = tpu.matmul %19, %20, %cst_19 {dimension_numbers = #tpu.dot_dimension_numbers<[1], [0], [0], [1], [0, 0, 1, 1], [], []>} : vector<8x128xf32>, vector<128x128xf32>, vector<8x128xf32> -> vector<8x128xf32>
    %c0_20 = arith.constant 0 : index
    %c0_21 = arith.constant 0 : index
    %22 = vector.load %arg9[%c0_20, %c0_21] : memref<1x128xf32, #tpu.memory_space<vmem>>, vector<1x128xf32>
    %23 = vector.broadcast %22 : vector<1x128xf32> to vector<8x128xf32>
    %24 = arith.addf %21, %23 : vector<8x128xf32>
    %cst_22 = arith.constant 0.000000e+00 : f32
    %25 = vector.broadcast %cst_22 : f32 to vector<8x128xf32>
    %26 = arith.maximumf %24, %25 : vector<8x128xf32>
    %c0_23 = arith.constant 0 : index
    %c0_24 = arith.constant 0 : index
    %27 = vector.load %arg10[%c0_23, %c0_24] : memref<8x128xf32, #tpu.memory_space<vmem>>, vector<8x128xf32>
    tpu.vector_store %arg10[%c0_23, %c0_24], %26 {strides = array<i32>} : memref<8x128xf32, #tpu.memory_space<vmem>>, vector<8x128xf32>,
    return
  }
  func.func @transform_0(%arg0: i32) -> (i32, i32) {
    %c0_i32 = arith.constant 0 : i32
    %c0_i32_0 = arith.constant 0 : i32
    return %arg0, %c0_i32 : i32, i32
  }
  func.func @transform_1(%arg0: i32) -> (i32, i32) {
    %c0_i32 = arith.constant 0 : i32
    %c0_i32_0 = arith.constant 0 : i32
    %c0_i32_1 = arith.constant 0 : i32
    return %c0_i32, %c0_i32_0 : i32, i32
  }
  func.func @transform_2(%arg0: i32) -> (i32, i32) {
    %c0_i32 = arith.constant 0 : i32
    %c0_i32_0 = arith.constant 0 : i32
    %c0_i32_1 = arith.constant 0 : i32
    return %c0_i32, %c0_i32_0 : i32, i32
  }
  func.func @transform_3(%arg0: i32) -> (i32, i32) {
    %c0_i32 = arith.constant 0 : i32
    %c0_i32_0 = arith.constant 0 : i32
    %c0_i32_1 = arith.constant 0 : i32
    return %c0_i32, %c0_i32_0 : i32, i32
  }
  func.func @transform_4(%arg0: i32) -> (i32, i32) {
    %c0_i32 = arith.constant 0 : i32
    %c0_i32_0 = arith.constant 0 : i32
    %c0_i32_1 = arith.constant 0 : i32
    return %c0_i32, %c0_i32_0 : i32, i32
  }
  func.func @transform_5(%arg0: i32) -> (i32, i32) {
    %c0_i32 = arith.constant 0 : i32
    %c0_i32_0 = arith.constant 0 : i32
    %c0_i32_1 = arith.constant 0 : i32
    return %c0_i32, %c0_i32_0 : i32, i32
  }
  func.func @transform_6(%arg0: i32) -> (i32, i32) {
    %c0_i32 = arith.constant 0 : i32
    %c0_i32_0 = arith.constant 0 : i32
    %c0_i32_1 = arith.constant 0 : i32
    return %c0_i32, %c0_i32_0 : i32, i32
  }
  func.func @transform_7(%arg0: i32) -> (i32, i32) {
    %c0_i32 = arith.constant 0 : i32
    %c0_i32_0 = arith.constant 0 : i32
    %c0_i32_1 = arith.constant 0 : i32
    return %c0_i32, %c0_i32_0 : i32, i32
  }
  func.func @transform_8(%arg0: i32) -> (i32, i32) {
    %c0_i32 = arith.constant 0 : i32
    %c0_i32_0 = arith.constant 0 : i32
    %c0_i32_1 = arith.constant 0 : i32
    return %c0_i32, %c0_i32_0 : i32, i32
  }
  func.func @transform_9(%arg0: i32) -> (i32, i32) {
    %c0_i32 = arith.constant 0 : i32
    %c0_i32_0 = arith.constant 0 : i32
    return %arg0, %c0_i32 : i32, i32
  }
}

</mosaic_0001>

<bundles_post_ra>
// kernel: simple_net_forward.1
= control target key start
LH: loop header
LB: loop body
LE: loop exit
PB: predicated region body
PF: predicated region fallthrough
CT: control target
= control target key end

     0   :  { %14 = vsyncpa [#allocation3], 0  ;;  %s1104_s0 = inlined_call_operand.vmem [shape: f32[8,128], index: 0, kind: input, shape index: {}]   ;;  %s1105_s1 = inlined_call_operand.vmem [shape: f32[128,128], index: 1, kind: input, shape index: {}]   ;;  %s1106_s2 = inlined_call_operand.vmem [shape: f32[1,128], index: 2, kind: input, shape index: {}]   ;;  %s1107_s3 = inlined_call_operand.hbm [shape: f32[128,128], index: 3, kind: input, shape index: {}]   ;;  %s1108_s4 = inlined_call_operand.vmem [shape: f32[1,128], index: 4, kind: input, shape index: {}]   ;;  %s1109_s5 = inlined_call_operand.hbm [shape: f32[128,128], index: 5, kind: input, shape index: {}]   ;;  %s1110_s6 = inlined_call_operand.vmem [shape: f32[1,128], index: 6, kind: input, shape index: {}]   ;;  %s1111_s7 = inlined_call_operand.hbm [shape: f32[128,128], index: 7, kind: input, shape index: {}]   ;;  %s1112_s8 = inlined_call_operand.vmem [shape: f32[1,128], index: 8, kind: input, shape index: {}]   ;;  %s1113_s9 = inlined_call_operand.hbm [shape: f32[8,128], index: 9, kind: output, shape index: {}]  }
   0x1   :  { %15 = vsyncpa [#allocation6], 0 }
   0x2   :  { %16 = vsyncpa [#allocation4], 0  ;;  %s878_s30 = smov [#allocation5]   ;;  %s879_s11 = smov [#allocation2]  }
   0x3   :  { %s42_s10 = sshll.u32 %s878_s30, 4  ;;  %s28_s12 = sshll.u32 %s879_s11, 4  ;;  %s43_s10 = int_to_ptr.vmem [resolvable:$true] %s42_s10  ;;  %s937_s12 = int_to_ptr.vmem [resolvable:$true] %s28_s12 }
   0x4   :  { %s784_s15 = scalar_lea.hbm %s1109_s5, 2048 }
   0x5   :  { %p785_p0 = scmp.ne.s32.totalorder %s1109_s5, %s784_s15  ;;  %p788_p1 = scmp.lt.u32.totalorder %s784_s15, %s1109_s5 }
   0x7   :  { %p790_p2 = pnand %p788_p1, %p785_p0 }
   0x9   :  { %793 = shalt.err (!%p790_p2)
}
   0xa   :  { %s794_s20 = scalar_lea.vmem %s43_s10, 2048  ;;  %p799_p4 = scmp.lt.s32.totalorder %s43_s10, %s43_s10 }
   0xb   :  { %p795_p3 = scmp.ne.s32.totalorder %s43_s10, %s794_s20  ;;  %p800_p5 = scmp.lt.s32.totalorder %s794_s20, %s794_s20 }
   0xd   :  { %p801_p6 = por %p800_p5, %p799_p4 }
   0xf   :  { %p802_p7 = pnand %p801_p6, %p795_p3 }
  0x11   :  { %805 = shalt.err (!%p802_p7)
}
  0x12   :  { %s880_s21 = smov 128   ;;  %s881_s22 = smov 8  }
  0x13   :  { %48 = dma.hbm_to_vmem [thread:$0]  %s1109_s5, 2048, %s43_s10, [#allocation6], %s880_s21, %s880_s21, %s881_s22  }
  0x14   :  { %s806_s27 = scalar_lea.hbm %s1107_s3, 2048 }
  0x15   :  { %p807_p8 = scmp.ne.s32.totalorder %s1107_s3, %s806_s27  ;;  %p810_p9 = scmp.lt.u32.totalorder %s806_s27, %s1107_s3 }
  0x17   :  { %p812_p10 = pnand %p810_p9, %p807_p8 }
  0x19   :  { %815 = shalt.err (!%p812_p10)
}
  0x1a   :  { %s816_s13 = scalar_lea.vmem %s937_s12, 2048  ;;  %p821_p12 = scmp.lt.s32.totalorder %s937_s12, %s937_s12 }
  0x1b   :  { %p817_p11 = scmp.ne.s32.totalorder %s937_s12, %s816_s13  ;;  %p822_p13 = scmp.lt.s32.totalorder %s816_s13, %s816_s13 }
  0x1d   :  { %p823_p0 = por %p822_p13, %p821_p12 }
  0x1f   :  { %p824_p1 = pnand %p823_p0, %p817_p11 }
  0x21   :  { %827 = shalt.err (!%p824_p1)
}
  0x22   :  { %34 = dma.hbm_to_vmem [thread:$0]  %s1107_s3, 2048, %s937_s12, [#allocation3], %s880_s21, %s880_s21, %s881_s22  }
  0x23   :  { %s882_s14 = smov [#allocation7]   ;;  %s828_s18 = scalar_lea.hbm %s1111_s7, 2048 }
  0x24   :  { %s56_s15 = sshll.u32 %s882_s14, 4  ;;  %p829_p2 = scmp.ne.s32.totalorder %s1111_s7, %s828_s18  ;;  %s57_s15 = int_to_ptr.vmem [resolvable:$true] %s56_s15 }
  0x25   :  { %p832_p3 = scmp.lt.u32.totalorder %s828_s18, %s1111_s7 }
  0x27   :  { %p834_p4 = pnand %p832_p3, %p829_p2 }
  0x29   :  { %837 = shalt.err (!%p834_p4)
}
  0x2a   :  { %s838_s25 = scalar_lea.vmem %s57_s15, 2048  ;;  %p843_p6 = scmp.lt.s32.totalorder %s57_s15, %s57_s15 }
  0x2b   :  { %p839_p5 = scmp.ne.s32.totalorder %s57_s15, %s838_s25  ;;  %p844_p7 = scmp.lt.s32.totalorder %s838_s25, %s838_s25 }
  0x2d   :  { %p845_p8 = por %p844_p7, %p843_p6 }
  0x2f   :  { %p846_p9 = pnand %p845_p8, %p839_p5 }
  0x31   :  { %849 = shalt.err (!%p846_p9)
}
  0x32   :  { %62 = dma.hbm_to_vmem [thread:$0]  %s1111_s7, 2048, %s57_s15, [#allocation6], %s880_s21, %s880_s21, %s881_s22  }
  0x33   :  { %872 = dma.done.wait [#allocation3], 2048  }
  0x34   :  { %873 = vsyncadd [#allocation3], 4294965248 }
  0x35   :  { %874 = dma.done.wait [#allocation6], 4096  }
  0x36   :  { %875 = vsyncadd [#allocation6], 4294963200  ;;  %v883_v0 = vmov 0.0|0.0   ;;  %vm884_vm0 = vmmov 0   ;;  %v885_v1 = vmov 0.0   ;;  %v75_v2 = vld [vmem:[%s1105_s1] sm:$0xff] }
  0x37   :  { %679 = vmatprep.subr.bf16.mxu0 %v883_v0  ;;  %571 = vmatprep.mubr.msk.f32.mxu0 %vm884_vm0, %v885_v1  ;;  %v76_v3 = vld [vmem:[%s1105_s1 + $0x8] sm:$0xff]  ;;  %v77_v4 = vld [vmem:[%s1105_s1 + $0x10] sm:$0xff]  ;;  %v78_v6 = vld [vmem:[%s1105_s1 + $0x18] sm:$0xff]  ;;  %s886_s16 = smov [#allocation8]  }
  0x38   :  { %703 = vmatprep.subr.bf16.mxu1 %v883_v0  ;;  %606 = vmatprep.mubr.msk.f32.mxu1 %vm884_vm0, %v885_v1  ;;  %v680_v5 = vpack.c.bf16 %v76_v3, %v75_v2  ;;  %v683_v7 = vpack.c.bf16 %v78_v6, %v77_v4  ;;  %v79_v8 = vld [vmem:[%s1105_s1 + $0x20] sm:$0xff]  ;;  %v80_v9 = vld [vmem:[%s1105_s1 + $0x28] sm:$0xff]  ;;  %v170_v12 = vld [vmem:[#allocation2 + $0x10] sm:$0xff]  ;;  %s457_s17 = sshll.u32 %s886_s16, 4  ;;  %s458_s17 = int_to_ptr.vmem [resolvable:$true] %s457_s17 }
  0x39   :  { %v168_v10 = vld [vmem:[#allocation2] sm:$0xff]  ;;  %v169_v11 = vld [vmem:[#allocation2 + $0x8] sm:$0xff]  ;;  %v171_v13 = vld [vmem:[#allocation2 + $0x18] sm:$0xff]  ;;  %v686_v14 = vpack.c.bf16 %v80_v9, %v79_v8  ;;  %s850_s18 = scalar_lea.vmem %s458_s17, 128  ;;  %p855_p11 = scmp.lt.s32.totalorder %s458_s17, %s458_s17 }
  0x3a   :  { %681 = vmatpush3.bf16.msra.mxu0 %v680_v5  ;;  %v704_v15 = vpack.c.bf16 %v169_v11, %v168_v10  ;;  %v81_v16 = vld [vmem:[%s1105_s1 + $0x30] sm:$0xff]  ;;  %v82_v17 = vld [vmem:[%s1105_s1 + $0x38] sm:$0xff]  ;;  %v707_v18 = vpack.c.bf16 %v171_v13, %v170_v12  ;;  %v172_v19 = vld [vmem:[#allocation2 + $0x20] sm:$0xff]  ;;  %p851_p10 = scmp.ne.s32.totalorder %s458_s17, %s850_s18  ;;  %p856_p12 = scmp.lt.s32.totalorder %s850_s18, %s850_s18 }
  0x3b   :  { %682 = vmatprep.subr.bf16.mxu0 %v883_v0  ;;  %v173_v20 = vld [vmem:[#allocation2 + $0x28] sm:$0xff]  ;;  %v689_v21 = vpack.c.bf16 %v82_v17, %v81_v16  ;;  %v83_v22 = vld [vmem:[%s1105_s1 + $0x40] sm:$0xff]  ;;  %v174_v25 = vld [vmem:[#allocation2 + $0x30] sm:$0xff] }
  0x3c   :  { %705 = vmatpush3.bf16.msra.mxu1 %v704_v15  ;;  %v84_v23 = vld [vmem:[%s1105_s1 + $0x48] sm:$0xff]  ;;  %v710_v24 = vpack.c.bf16 %v173_v20, %v172_v19  ;;  %v175_v26 = vld [vmem:[#allocation2 + $0x38] sm:$0xff]  ;;  %v85_v28 = vld [vmem:[%s1105_s1 + $0x50] sm:$0xff]  ;;  %p857_p13 = por %p856_p12, %p855_p11 }
  0x3d   :  { %706 = vmatprep.subr.bf16.mxu1 %v883_v0  ;;  %v692_v27 = vpack.c.bf16 %v84_v23, %v83_v22  ;;  %v86_v29 = vld [vmem:[%s1105_s1 + $0x58] sm:$0xff]  ;;  %v713_v30 = vpack.c.bf16 %v175_v26, %v174_v25  ;;  %v176_v31 = vld [vmem:[#allocation2 + $0x40] sm:$0xff]  ;;  %v177_v32 = vld [vmem:[#allocation2 + $0x48] sm:$0xff] }
  0x3e   :  { %684 = vmatpush3.bf16.msra.mxu0 %v683_v7  ;;  %v695_v33 = vpack.c.bf16 %v86_v29, %v85_v28  ;;  %v87_v34 = vld [vmem:[%s1105_s1 + $0x60] sm:$0xff]  ;;  %v88_v35 = vld [vmem:[%s1105_s1 + $0x68] sm:$0xff]  ;;  %v716_v36 = vpack.c.bf16 %v177_v32, %v176_v31  ;;  %v178_v37 = vld [vmem:[#allocation2 + $0x50] sm:$0xff]  ;;  %p858_p0 = pnand %p857_p13, %p851_p10 }
  0x3f   :  { %685 = vmatprep.subr.bf16.mxu0 %v883_v0  ;;  %v179_v38 = vld [vmem:[#allocation2 + $0x58] sm:$0xff]  ;;  %v698_v39 = vpack.c.bf16 %v88_v35, %v87_v34  ;;  %v89_v40 = vld [vmem:[%s1105_s1 + $0x70] sm:$0xff]  ;;  %v180_v43 = vld [vmem:[#allocation2 + $0x60] sm:$0xff] }
  0x40   :  { %708 = vmatpush3.bf16.msra.mxu1 %v707_v18  ;;  %v90_v41 = vld [vmem:[%s1105_s1 + $0x78] sm:$0xff]  ;;  %v719_v42 = vpack.c.bf16 %v179_v38, %v178_v37  ;;  %v181_v44 = vld [vmem:[#allocation2 + $0x68] sm:$0xff]  ;;  %v74_v47 = vld [vmem:[%s1104_s0] sm:$0xff] }
  0x41   :  { %709 = vmatprep.subr.bf16.mxu1 %v883_v0  ;;  %v701_v45 = vpack.c.bf16 %v90_v41, %v89_v40  ;;  %v722_v46 = vpack.c.bf16 %v181_v44, %v180_v43  ;;  %v182_v48 = vld [vmem:[#allocation2 + $0x70] sm:$0xff]  ;;  %v183_v49 = vld [vmem:[#allocation2 + $0x78] sm:$0xff]  ;;  %v262_v51 = vld [vmem:[#allocation5] sm:$0xff] }
  0x42   :  { %687 = vmatpush3.bf16.msra.mxu0 %v686_v14  ;;  %v725_v50 = vpack.c.bf16 %v183_v49, %v182_v48  ;;  %v263_v52 = vld [vmem:[#allocation5 + $0x8] sm:$0xff]  ;;  %v264_v53 = vld [vmem:[#allocation5 + $0x10] sm:$0xff]  ;;  %v265_v55 = vld [vmem:[#allocation5 + $0x18] sm:$0xff] }
  0x43   :  { %688 = vmatprep.subr.bf16.mxu0 %v883_v0  ;;  %v728_v54 = vpack.c.bf16 %v263_v52, %v262_v51  ;;  %v731_v56 = vpack.c.bf16 %v265_v55, %v264_v53  ;;  %v266_v57 = vld [vmem:[#allocation5 + $0x20] sm:$0xff]  ;;  %v267_v58 = vld [vmem:[#allocation5 + $0x28] sm:$0xff]  ;;  %v268_v60 = vld [vmem:[#allocation5 + $0x30] sm:$0xff] }
  0x44   :  { %711 = vmatpush3.bf16.msra.mxu1 %v710_v24  ;;  %v734_v59 = vpack.c.bf16 %v267_v58, %v266_v57  ;;  %v269_v61 = vld [vmem:[#allocation5 + $0x38] sm:$0xff]  ;;  %v270_v63 = vld [vmem:[#allocation5 + $0x40] sm:$0xff]  ;;  %v271_v2 = vld [vmem:[#allocation5 + $0x48] sm:$0xff] }
  0x45   :  { %712 = vmatprep.subr.bf16.mxu1 %v883_v0  ;;  %v737_v62 = vpack.c.bf16 %v269_v61, %v268_v60  ;;  %v740_v3 = vpack.c.bf16 %v271_v2, %v270_v63  ;;  %v272_v4 = vld [vmem:[#allocation5 + $0x50] sm:$0xff]  ;;  %v273_v5 = vld [vmem:[#allocation5 + $0x58] sm:$0xff]  ;;  %v274_v7 = vld [vmem:[#allocation5 + $0x60] sm:$0xff] }
  0x46   :  { %690 = vmatpush3.bf16.msra.mxu0 %v689_v21  ;;  %v743_v6 = vpack.c.bf16 %v273_v5, %v272_v4  ;;  %v275_v8 = vld [vmem:[#allocation5 + $0x68] sm:$0xff]  ;;  %v467_v10 = vld [vmem:[%s1106_s2] ss:$0 sm:$0xff]  ;;  %v276_v14 = vld [vmem:[#allocation5 + $0x70] sm:$0xff] }
  0x47   :  { %691 = vmatprep.subr.bf16.mxu0 %v883_v0  ;;  %v746_v9 = vpack.c.bf16 %v275_v8, %v274_v7  ;;  %v277_v15 = vld [vmem:[#allocation5 + $0x78] sm:$0xff]  ;;  %v356_v17 = vld [vmem:[#allocation7] sm:$0xff]  ;;  %v357_v18 = vld [vmem:[#allocation7 + $0x8] sm:$0xff] }
  0x48   :  { %714 = vmatpush3.bf16.msra.mxu1 %v713_v30  ;;  %v749_v16 = vpack.c.bf16 %v277_v15, %v276_v14  ;;  %v358_v19 = vld [vmem:[#allocation7 + $0x10] sm:$0xff]  ;;  %v752_v20 = vpack.c.bf16 %v357_v18, %v356_v17  ;;  %v359_v21 = vld [vmem:[#allocation7 + $0x18] sm:$0xff]  ;;  %v360_v23 = vld [vmem:[#allocation7 + $0x20] sm:$0xff] }
  0x49   :  { %715 = vmatprep.subr.bf16.mxu1 %v883_v0  ;;  %v755_v22 = vpack.c.bf16 %v359_v21, %v358_v19  ;;  %v361_v24 = vld [vmem:[#allocation7 + $0x28] sm:$0xff]  ;;  %v363_v26 = vld [vmem:[#allocation7 + $0x38] sm:$0xff]  ;;  %v364_v28 = vld [vmem:[#allocation7 + $0x40] sm:$0xff] }
  0x4a   :  { %693 = vmatpush3.bf16.msra.mxu0 %v692_v27  ;;  %v758_v25 = vpack.c.bf16 %v361_v24, %v360_v23  ;;  %v365_v29 = vld [vmem:[#allocation7 + $0x48] sm:$0xff]  ;;  %v366_v31 = vld [vmem:[#allocation7 + $0x50] sm:$0xff]  ;;  %v367_v32 = vld [vmem:[#allocation7 + $0x58] sm:$0xff] }
  0x4b   :  { %694 = vmatprep.subr.bf16.mxu0 %v883_v0  ;;  %v764_v30 = vpack.c.bf16 %v365_v29, %v364_v28  ;;  %v368_v34 = vld [vmem:[#allocation7 + $0x60] sm:$0xff]  ;;  %v369_v35 = vld [vmem:[#allocation7 + $0x68] sm:$0xff]  ;;  %v371_v43 = vld [vmem:[#allocation7 + $0x78] sm:$0xff] }
  0x4c   :  { %717 = vmatpush3.bf16.msra.mxu1 %v716_v36  ;;  %v770_v36 = vpack.c.bf16 %v369_v35, %v368_v34  ;;  %v468_v37 = vld [vmem:[%s1108_s4] ss:$0 sm:$0xff] }
  0x4d   :  { %718 = vmatprep.subr.bf16.mxu1 %v883_v0  ;;  %v470_v49 = vld [vmem:[%s1112_s8] ss:$0 sm:$0xff] }
  0x4e   :  { %696 = vmatpush3.bf16.msra.mxu0 %v695_v33  ;;  %v767_v33 = vpack.c.bf16 %v367_v32, %v366_v31 }
  0x4f   :  { %697 = vmatprep.subr.bf16.mxu0 %v883_v0 }
  0x50   :  { %720 = vmatpush3.bf16.msra.mxu1 %v719_v42  ;;  %v370_v42 = vld [vmem:[#allocation7 + $0x70] sm:$0xff] }
  0x51   :  { %721 = vmatprep.subr.bf16.mxu1 %v883_v0  ;;  %v773_v44 = vpack.c.bf16 %v371_v43, %v370_v42 }
  0x52   :  { %699 = vmatpush3.bf16.msra.mxu0 %v698_v39 }
  0x53   :  { %700 = vmatprep.subr.bf16.mxu0 %v883_v0 }
  0x54   :  { %723 = vmatpush3.bf16.msra.mxu1 %v722_v46 }
  0x55   :  { %724 = vmatprep.subr.bf16.mxu1 %v883_v0 }
  0x56   :  { %702 = vmatpush3.bf16.msra.mxu0 %v701_v45  ;;  %v469_v45 = vld [vmem:[%s1110_s6] ss:$0 sm:$0xff] }
  0x57   :  { %727 = vmatprep.subr.bf16.mxu0 %v883_v0 }
  0x58   :  { %726 = vmatpush3.bf16.msra.mxu1 %v725_v50 }
  0x59   :  { %572 = vmatmul.mubr.f32.vlgmr.msra.gmra.mrb[0].mxu0 %v74_v47  ;;  %751 = vmatprep.subr.bf16.mxu1 %v883_v0 }
  0x5a   :  { %641 = vmatprep.mubr.msk.f32.mxu0 %vm884_vm0, %v885_v1  ;;  %729 = vmatpush3.bf16.msra.mxu0 %v728_v54 }
  0x5b   :  { %730 = vmatprep.subr.bf16.mxu0 %v883_v0 }
  0x5e   :  { %732 = vmatpush3.bf16.msra.mxu0 %v731_v56 }
  0x5f   :  { %733 = vmatprep.subr.bf16.mxu0 %v883_v0 }
  0x62   :  { %735 = vmatpush3.bf16.msra.mxu0 %v734_v59 }
  0x63   :  { %736 = vmatprep.subr.bf16.mxu0 %v883_v0 }
  0x66   :  { %738 = vmatpush3.bf16.msra.mxu0 %v737_v62 }
  0x67   :  { %739 = vmatprep.subr.bf16.mxu0 %v883_v0 }
  0x6a   :  { %741 = vmatpush3.bf16.msra.mxu0 %v740_v3 }
  0x6b   :  { %742 = vmatprep.subr.bf16.mxu0 %v883_v0 }
  0x6e   :  { %744 = vmatpush3.bf16.msra.mxu0 %v743_v6 }
  0x6f   :  { %745 = vmatprep.subr.bf16.mxu0 %v883_v0 }
  0x72   :  { %747 = vmatpush3.bf16.msra.mxu0 %v746_v9 }
  0x73   :  { %748 = vmatprep.subr.bf16.mxu0 %v883_v0 }
  0x76   :  { %750 = vmatpush3.bf16.msra.mxu0 %v749_v16 }
 0x12c   :  { %v164_v11 = vpop.f32.mrb[0].mxu0 }
 0x12d   :  { %v165_v12 = vadd.f32 %v467_v10, %v164_v11  ;;  %v573_v13 = vpop.f32.mrb[1].mxu0 }
 0x12f   :  { %607 = vmatmul.mubr.f32.vlgmr.msra.gmra.mrb[0].mxu1 %v165_v12 }
 0x130   :  { %676 = vmatprep.mubr.msk.f32.mxu1 %vm884_vm0, %v885_v1  ;;  %753 = vmatpush3.bf16.msra.mxu1 %v752_v20  ;;  %v362_v1 = vld [vmem:[#allocation7 + $0x30] sm:$0xff] }
 0x131   :  { %754 = vmatprep.subr.bf16.mxu1 %v883_v0  ;;  %v761_v27 = vpack.c.bf16 %v363_v26, %v362_v1 }
 0x134   :  { %756 = vmatpush3.bf16.msra.mxu1 %v755_v22 }
 0x135   :  { %757 = vmatprep.subr.bf16.mxu1 %v883_v0 }
 0x138   :  { %759 = vmatpush3.bf16.msra.mxu1 %v758_v25 }
 0x139   :  { %760 = vmatprep.subr.bf16.mxu1 %v883_v0 }
 0x13c   :  { %762 = vmatpush3.bf16.msra.mxu1 %v761_v27 }
 0x13d   :  { %763 = vmatprep.subr.bf16.mxu1 %v883_v0 }
 0x140   :  { %765 = vmatpush3.bf16.msra.mxu1 %v764_v30 }
 0x141   :  { %766 = vmatprep.subr.bf16.mxu1 %v883_v0 }
 0x144   :  { %768 = vmatpush3.bf16.msra.mxu1 %v767_v33 }
 0x145   :  { %769 = vmatprep.subr.bf16.mxu1 %v883_v0 }
 0x148   :  { %771 = vmatpush3.bf16.msra.mxu1 %v770_v36 }
 0x149   :  { %772 = vmatprep.subr.bf16.mxu1 %v883_v0 }
 0x14c   :  { %774 = vmatpush3.bf16.msra.mxu1 %v773_v44 }
 0x202   :  { %v257_v38 = vpop.f32.mrb[0].mxu1 }
 0x203   :  { %v258_v39 = vadd.f32 %v468_v37, %v257_v38  ;;  %v608_v40 = vpop.f32.mrb[1].mxu1 }
 0x205   :  { %v261_v41 = vmax.f32 %v258_v39, 0.0 }
 0x207   :  { %642 = vmatmul.mubr.f32.vlgmr.msra.gmra.mrb[2].mxu0 %v261_v41 }
 0x2da   :  { %v351_v46 = vpop.f32.mrb[2].mxu0 }
 0x2db   :  { %v352_v47 = vadd.f32 %v469_v45, %v351_v46  ;;  %v643_v0 = vpop.f32.mrb[3].mxu0 }
 0x2dd   :  { %v355_v48 = vmax.f32 %v352_v47, 0.0 }
 0x2df   :  { %677 = vmatmul.mubr.f32.vlgmr.msra.gmra.mrb[2].mxu1 %v355_v48 }
 0x3b2   :  { %v445_v50 = vpop.f32.mrb[2].mxu1 }
 0x3b3   :  { %v446_v51 = vadd.f32 %v470_v49, %v445_v50  ;;  %v678_v52 = vpop.f32.mrb[3].mxu1 }
 0x3b5   :  { %v449_v53 = vmax.f32 %v446_v51, 0.0 }
 0x3b7   :  { %450 = vst [vmem:[#allocation8] sm:$0xff] %v449_v53 }
 0x3b8   :  { %861 = shalt.err (!%p858_p0)
}
 0x3b9   :  { %s862_s20 = scalar_lea.hbm %s1113_s9, 128 }
 0x3ba   :  { %p863_p1 = scmp.ne.s32.totalorder %s1113_s9, %s862_s20  ;;  %p866_p2 = scmp.lt.u32.totalorder %s862_s20, %s1113_s9 }
 0x3bc   :  { %p868_p3 = pnand %p866_p2, %p863_p1 }
 0x3be   :  { %871 = shalt.err (!%p868_p3)
}
 0x3bf   :  { %460 = dma.vmem_to_hbm [thread:$0]  %s458_s17, 128, %s1113_s9, [#allocation4]  }
 0x3c0   :  { %876 = dma.done.wait [#allocation4], 128  }
 0x3c1   :  { %877 = vsyncadd [#allocation4], 4294967168 }
 0x3c2   :  { %464 = vsyncpa [#allocation3], 1 }
 0x3c3   :  { %465 = vsyncpa [#allocation6], 1 }
 0x3c4   :  { %466 = vsyncpa [#allocation4], 1 }

</bundles_post_ra>
